<compile_context>
chip_gen: v7x
topology: tpu7x:2x2x1
jax: 0.10.0
libtpu: 0.0.40
codegen_flags: <defaults>
</compile_context>

<pallas_src>
import functools
import math

import jax
import jax.numpy as jnp
from jax.experimental import pallas as pl
from jax.experimental.pallas import tpu as pltpu


def _cdiv(a: int, b: int) -> int:
    return -(-a // b)


def _round_up(n: int, m: int) -> int:
    return ((n + m - 1) // m) * m


def _vmem_capacity_bytes() -> int:
    try:
        cap = int(pltpu.get_tpu_info().vmem_capacity_bytes)
        if cap > 0:
            return cap
    except Exception:
        pass
    return 64 << 20  # conservative (v7x-sized) default


def _num_tensorcores() -> int:
    # Only v7x has 2 TensorCores per chip; v5e/v6e are single-TC.
    try:
        kind = jax.devices()[0].device_kind.lower()
    except Exception:
        return 1
    return 2 if "v7" in kind else 1


def _rmsnorm_kernel(x_ref, w_ref, o_ref, *, eps):
    """Plain path (hidden >= 128 lanes, or not foldable)."""
    xf = x_ref[...].astype(jnp.float32)
    ms = jnp.mean(xf * xf, axis=-1, keepdims=True)        # XLU reduce
    inv_rms = jax.lax.rsqrt(ms + eps)                      # EUP
    w = w_ref[...].astype(jnp.float32)
    # Re-read x_ref for the scale instead of reusing xf so Mosaic does not
    # have to keep a full-tile f32 upcast live across the reduce.
    o_ref[...] = (x_ref[...].astype(jnp.float32) * (inv_rms * w)).astype(o_ref.dtype)


def _rmsnorm_kernel_folded(x_ref, w_ref, m_ref, o_ref, *, eps, inv_dim, fold):
    """Lane-dense path for hidden < 128: `fold` independent rows packed into
    the lane axis.  x_ref: (row_tile, fold*dim); w_ref: (1, fold*dim) weight
    tiled `fold` times; m_ref: (fold, fold*dim) 0/1 segment masks."""
    xf = x_ref[...].astype(jnp.float32)
    sq = xf * xf
    inv_b = None
    for j in range(fold):                                  # small static unroll
        mask_j = m_ref[j:j + 1, :]                         # (1, fold*dim)
        ms_j = jnp.sum(sq * mask_j, axis=-1, keepdims=True) * inv_dim
        inv_j = jax.lax.rsqrt(ms_j + eps)                  # (row_tile, 1)
        part = inv_j * mask_j                              # (row_tile, fold*dim)
        inv_b = part if inv_b is None else inv_b + part
    w = w_ref[...].astype(jnp.float32)
    o_ref[...] = (x_ref[...].astype(jnp.float32) * inv_b * w).astype(o_ref.dtype)


def rms_norm(x, weight, eps: float = 1e-5, *, block_bytes=None):
    """RMSNorm over the last axis of x with an affine weight of shape (dim,)."""
    dim = x.shape[-1]
    assert weight.shape == (dim,)
    orig_shape = x.shape
    rows = math.prod(orig_shape[:-1]) if len(orig_shape) > 1 else 1

    itemsize = jnp.dtype(x.dtype).itemsize
    sublane = {4: 8, 2: 16, 1: 32}.get(itemsize, 8)

    # Generation-aware sizing (v7x: 64 MiB VMEM / 2 TCs; v5e/v6e: 128 MiB / 1 TC).
    vmem_cap = _vmem_capacity_bytes()
    num_tc = _num_tensorcores()
    if block_bytes is None:
        target_block_bytes = max(4 << 20, vmem_cap // 10)
    else:
        target_block_bytes = int(block_bytes)
    # Budget: 2x(in) + 2x(out) double-buffered blocks + f32 working temps.
    vmem_limit_bytes = int(min(vmem_cap - (8 << 20),
                               max(32 << 20, 8 * target_block_bytes)))

    x2d = x.reshape(rows, dim)

    # Lane-dense fold for small hidden: pack `fold` independent rows into the
    # 128-lane axis so loads/stores are dense vld/vst instead of masked ones.
    fold = 1
    if dim < 128 and 128 % dim == 0 and (128 // dim) <= 16 and rows % (128 // dim) == 0:
        fold = 128 // dim
    # TODO(synk): small hidden dims that do not divide 128 (or row counts not
    # divisible by the fold) still take the lane-sparse path below.

    if fold > 1:
        rows_k = rows // fold
        dim_k = dim * fold
        x2d = x2d.reshape(rows_k, dim_k)        # contiguous reshape: no HBM copy
        w_row = jnp.tile(weight, fold).reshape(1, dim_k)
        seg = jnp.arange(dim_k, dtype=jnp.int32) // dim
        masks = (seg[None, :] ==
                 jnp.arange(fold, dtype=jnp.int32)[:, None]).astype(jnp.float32)
        kernel = functools.partial(_rmsnorm_kernel_folded, eps=eps,
                                   inv_dim=1.0 / dim, fold=fold)
    else:
        rows_k, dim_k = rows, dim
        w_row = weight.reshape(1, dim)
        masks = None
        kernel = functools.partial(_rmsnorm_kernel, eps=eps)

    # Guard: very wide hidden that cannot fit even the minimum sublane-high
    # block (plus buffering and f32 temps) -> clear error instead of VMEM OOM.
    min_block_bytes = sublane * dim_k * itemsize
    if 8 * min_block_bytes > vmem_limit_bytes:
        # TODO(synk): chunk the hidden axis (two-pass sum-of-squares + scale)
        # for very wide dims instead of erroring out.
        raise ValueError(
            f"hidden={dim} is too wide for a single-block RMSNorm within "
            f"{vmem_limit_bytes} bytes of VMEM; chunked-hidden path not implemented.")

    # Largest sublane-aligned row tile within the per-block budget.
    rows_aligned = _round_up(rows_k, sublane)
    vmem_rows = max(sublane,
                    (target_block_bytes // (dim_k * itemsize)) // sublane * sublane)
    row_tile = min(vmem_rows, rows_aligned)
    # Only split the grid for multi-TC chips (v7x); on single-TC v5e/v6e the
    # extra grid steps are pure per-step overhead.
    if num_tc >= 2 and _cdiv(rows_aligned, row_tile) < 2 and rows_aligned >= 2 * sublane:
        row_tile = _round_up(_cdiv(rows_aligned, 2), sublane)
    if row_tile >= rows_k:
        row_tile = rows_k                        # single block == full array dims
    grid = _cdiv(rows_k, row_tile)
    # Non-divisible row counts: keep grid = cdiv and let Pallas mask the ragged
    # last block (rows are independent, so padded-tail garbage is never stored
    # to valid rows).  No host-side jnp.pad / slice round-trip through HBM.

    row_spec = pl.BlockSpec((row_tile, dim_k), lambda i: (i, 0))
    vmem_whole = pl.BlockSpec(memory_space=pltpu.MemorySpace.VMEM)

    if fold > 1:
        in_specs = [row_spec, vmem_whole, vmem_whole]
        args = (x2d, w_row, masks)
    else:
        in_specs = [row_spec, vmem_whole]
        args = (x2d, w_row)

    out2d = pl.pallas_call(
        kernel,
        out_shape=jax.ShapeDtypeStruct((rows_k, dim_k), x.dtype),
        grid_spec=pltpu.PrefetchScalarGridSpec(
            num_scalar_prefetch=0,
            grid=(grid,),
            in_specs=in_specs,
            out_specs=row_spec,
        ),
        compiler_params=pltpu.CompilerParams(
            dimension_semantics=("parallel",),
            vmem_limit_bytes=vmem_limit_bytes,
        ),
    )(*args)

    return out2d.reshape(orig_shape)


if __name__ == "__main__":
    key = jax.random.PRNGKey(0)
    kx, kw, kx2 = jax.random.split(key, 3)

    # Primary run: small-hidden model shape (exercises the lane-dense fold path).
    batch, seq, hidden = 2, 8, 32
    x = jax.random.normal(kx, (batch, seq, hidden), dtype=jnp.float32)
    # Module initializes weight to ones; perturb deterministically so the
    # affine scale is actually exercised.
    weight = jnp.ones((hidden,), dtype=jnp.float32) + 0.01 * jax.random.normal(
        kw, (hidden,), dtype=jnp.float32)

    out = rms_norm(x, weight, eps=1e-5)
    out = jax.block_until_ready(out)

    x32 = x.astype(jnp.float32)
    ref = x32 * jax.lax.rsqrt(
        jnp.mean(x32 * x32, axis=-1, keepdims=True) + 1e-5) * weight
    assert out.shape == x.shape
    assert jnp.allclose(out, ref.astype(out.dtype), atol=1e-5, rtol=1e-5)

    # Secondary check: ragged row count with a forced tiny block so the masked
    # partial-tail pipeline path (no host pad/slice) is exercised.
    x2 = jax.random.normal(kx2, (20, 256), dtype=jnp.float32)
    w2 = jnp.linspace(0.9, 1.1, 256, dtype=jnp.float32)
    out2 = jax.block_until_ready(rms_norm(x2, w2, eps=1e-5, block_bytes=8 * 256 * 4))
    ref2 = x2 * jax.lax.rsqrt(jnp.mean(x2 * x2, axis=-1, keepdims=True) + 1e-5) * w2
    assert jnp.allclose(out2, ref2, atol=1e-5, rtol=1e-5)

    print("KERNEL_OK")
</pallas_src>

<mosaic_0001>
module attributes {stable_mosaic.version = 11 : i64} {
  func.func @_rmsnorm_kernel_folded(%arg0: i32, %arg1: memref<4x128xf32, #tpu.memory_space<vmem>>, %arg2: memref<1x128xf32, #tpu.memory_space<vmem>>, %arg3: memref<4x128xf32, #tpu.memory_space<vmem>>, %arg4: memref<4x128xf32, #tpu.memory_space<vmem>>) attributes {dimension_semantics = [#tpu.dimension_semantics<parallel>], iteration_bounds = array<i64: 1>, scalar_prefetch = 0 : i64, scratch_operands = 0 : i64, tpu.core_type = #tpu.core_type<tc>, window_params = [{transform_indices = @transform_0, window_bounds = array<i64: 4, 128>}, {pipeline_mode = #tpu.pipeline_mode<synchronous>, transform_indices = @transform_1, window_bounds = array<i64: 1, 128>}, {pipeline_mode = #tpu.pipeline_mode<synchronous>, transform_indices = @transform_2, window_bounds = array<i64: 4, 128>}, {transform_indices = @transform_3, window_bounds = array<i64: 4, 128>}]} {
    %c0 = arith.constant 0 : index
    %c0_0 = arith.constant 0 : index
    %0 = vector.load %arg1[%c0, %c0_0] : memref<4x128xf32, #tpu.memory_space<vmem>>, vector<4x128xf32>
    %1 = arith.mulf %0, %0 : vector<4x128xf32>
    %c0_1 = arith.constant 0 : index
    %c0_2 = arith.constant 0 : index
    %2 = vector.load %arg3[%c0_1, %c0_2] : memref<4x128xf32, #tpu.memory_space<vmem>>, vector<1x128xf32>
    %3 = vector.broadcast %2 : vector<1x128xf32> to vector<4x128xf32>
    %4 = arith.mulf %1, %3 : vector<4x128xf32>
    %cst = arith.constant dense<0.000000e+00> : vector<4xf32>
    %5 = vector.multi_reduction <add>, %4, %cst [1] : vector<4x128xf32> to vector<4xf32>
    %6 = vector.shape_cast %5 : vector<4xf32> to vector<4x1xf32>
    %cst_3 = arith.constant 3.125000e-02 : f32
    %7 = vector.broadcast %cst_3 : f32 to vector<4x1xf32>
    %8 = arith.mulf %6, %7 : vector<4x1xf32>
    %cst_4 = arith.constant 9.99999974E-6 : f32
    %9 = vector.broadcast %cst_4 : f32 to vector<4x1xf32>
    %10 = arith.addf %8, %9 : vector<4x1xf32>
    %11 = math.rsqrt %10 : vector<4x1xf32>
    %12 = vector.broadcast %11 : vector<4x1xf32> to vector<4x128xf32>
    %13 = vector.broadcast %2 : vector<1x128xf32> to vector<4x128xf32>
    %14 = arith.mulf %12, %13 : vector<4x128xf32>
    %c1 = arith.constant 1 : index
    %c0_5 = arith.constant 0 : index
    %15 = vector.load %arg3[%c1, %c0_5] : memref<4x128xf32, #tpu.memory_space<vmem>>, vector<1x128xf32>
    %16 = vector.broadcast %15 : vector<1x128xf32> to vector<4x128xf32>
    %17 = arith.mulf %1, %16 : vector<4x128xf32>
    %cst_6 = arith.constant dense<0.000000e+00> : vector<4xf32>
    %18 = vector.multi_reduction <add>, %17, %cst_6 [1] : vector<4x128xf32> to vector<4xf32>
    %19 = vector.shape_cast %18 : vector<4xf32> to vector<4x1xf32>
    %cst_7 = arith.constant 3.125000e-02 : f32
    %20 = vector.broadcast %cst_7 : f32 to vector<4x1xf32>
    %21 = arith.mulf %19, %20 : vector<4x1xf32>
    %cst_8 = arith.constant 9.99999974E-6 : f32
    %22 = vector.broadcast %cst_8 : f32 to vector<4x1xf32>
    %23 = arith.addf %21, %22 : vector<4x1xf32>
    %24 = math.rsqrt %23 : vector<4x1xf32>
    %25 = vector.broadcast %24 : vector<4x1xf32> to vector<4x128xf32>
    %26 = vector.broadcast %15 : vector<1x128xf32> to vector<4x128xf32>
    %27 = arith.mulf %25, %26 : vector<4x128xf32>
    %28 = arith.addf %14, %27 : vector<4x128xf32>
    %c2 = arith.constant 2 : index
    %c0_9 = arith.constant 0 : index
    %29 = vector.load %arg3[%c2, %c0_9] : memref<4x128xf32, #tpu.memory_space<vmem>>, vector<1x128xf32>
    %30 = vector.broadcast %29 : vector<1x128xf32> to vector<4x128xf32>
    %31 = arith.mulf %1, %30 : vector<4x128xf32>
    %cst_10 = arith.constant dense<0.000000e+00> : vector<4xf32>
    %32 = vector.multi_reduction <add>, %31, %cst_10 [1] : vector<4x128xf32> to vector<4xf32>
    %33 = vector.shape_cast %32 : vector<4xf32> to vector<4x1xf32>
    %cst_11 = arith.constant 3.125000e-02 : f32
    %34 = vector.broadcast %cst_11 : f32 to vector<4x1xf32>
    %35 = arith.mulf %33, %34 : vector<4x1xf32>
    %cst_12 = arith.constant 9.99999974E-6 : f32
    %36 = vector.broadcast %cst_12 : f32 to vector<4x1xf32>
    %37 = arith.addf %35, %36 : vector<4x1xf32>
    %38 = math.rsqrt %37 : vector<4x1xf32>
    %39 = vector.broadcast %38 : vector<4x1xf32> to vector<4x128xf32>
    %40 = vector.broadcast %29 : vector<1x128xf32> to vector<4x128xf32>
    %41 = arith.mulf %39, %40 : vector<4x128xf32>
    %42 = arith.addf %28, %41 : vector<4x128xf32>
    %c3 = arith.constant 3 : index
    %c0_13 = arith.constant 0 : index
    %43 = vector.load %arg3[%c3, %c0_13] : memref<4x128xf32, #tpu.memory_space<vmem>>, vector<1x128xf32>
    %44 = vector.broadcast %43 : vector<1x128xf32> to vector<4x128xf32>
    %45 = arith.mulf %1, %44 : vector<4x128xf32>
    %cst_14 = arith.constant dense<0.000000e+00> : vector<4xf32>
    %46 = vector.multi_reduction <add>, %45, %cst_14 [1] : vector<4x128xf32> to vector<4xf32>
    %47 = vector.shape_cast %46 : vector<4xf32> to vector<4x1xf32>
    %cst_15 = arith.constant 3.125000e-02 : f32
    %48 = vector.broadcast %cst_15 : f32 to vector<4x1xf32>
    %49 = arith.mulf %47, %48 : vector<4x1xf32>
    %cst_16 = arith.constant 9.99999974E-6 : f32
    %50 = vector.broadcast %cst_16 : f32 to vector<4x1xf32>
    %51 = arith.addf %49, %50 : vector<4x1xf32>
    %52 = math.rsqrt %51 : vector<4x1xf32>
    %53 = vector.broadcast %52 : vector<4x1xf32> to vector<4x128xf32>
    %54 = vector.broadcast %43 : vector<1x128xf32> to vector<4x128xf32>
    %55 = arith.mulf %53, %54 : vector<4x128xf32>
    %56 = arith.addf %42, %55 : vector<4x128xf32>
    %c0_17 = arith.constant 0 : index
    %c0_18 = arith.constant 0 : index
    %57 = vector.load %arg2[%c0_17, %c0_18] : memref<1x128xf32, #tpu.memory_space<vmem>>, vector<1x128xf32>
    %c0_19 = arith.constant 0 : index
    %c0_20 = arith.constant 0 : index
    %58 = vector.load %arg1[%c0_19, %c0_20] : memref<4x128xf32, #tpu.memory_space<vmem>>, vector<4x128xf32>
    %59 = arith.mulf %58, %56 : vector<4x128xf32>
    %60 = vector.broadcast %57 : vector<1x128xf32> to vector<4x128xf32>
    %61 = arith.mulf %59, %60 : vector<4x128xf32>
    %c0_21 = arith.constant 0 : index
    %c0_22 = arith.constant 0 : index
    %62 = vector.load %arg4[%c0_21, %c0_22] : memref<4x128xf32, #tpu.memory_space<vmem>>, vector<4x128xf32>
    tpu.vector_store %arg4[%c0_21, %c0_22], %61 {strides = array<i32>} : memref<4x128xf32, #tpu.memory_space<vmem>>, vector<4x128xf32>,
    return
  }
  func.func @transform_0(%arg0: i32) -> (i32, i32) {
    %c0_i32 = arith.constant 0 : i32
    %c0_i32_0 = arith.constant 0 : i32
    return %arg0, %c0_i32 : i32, i32
  }
  func.func @transform_1(%arg0: i32) -> (i32, i32) {
    %c0_i32 = arith.constant 0 : i32
    %c0_i32_0 = arith.constant 0 : i32
    %c0_i32_1 = arith.constant 0 : i32
    return %c0_i32, %c0_i32_0 : i32, i32
  }
  func.func @transform_2(%arg0: i32) -> (i32, i32) {
    %c0_i32 = arith.constant 0 : i32
    %c0_i32_0 = arith.constant 0 : i32
    %c0_i32_1 = arith.constant 0 : i32
    return %c0_i32, %c0_i32_0 : i32, i32
  }
  func.func @transform_3(%arg0: i32) -> (i32, i32) {
    %c0_i32 = arith.constant 0 : i32
    %c0_i32_0 = arith.constant 0 : i32
    return %arg0, %c0_i32 : i32, i32
  }
}

</mosaic_0001>

<bundles_post_ra>
// kernel: tpu_custom_call.1
= control target key start
LH: loop header
LB: loop body
LE: loop exit
PB: predicated region body
PF: predicated region fallthrough
CT: control target
= control target key end

     0   :  { %8 = vsyncpa [#allocation3], 0  ;;  %s234_s0 = inlined_call_operand.hbm [shape: f32[4,128], index: 0, kind: input, shape index: {}]   ;;  %s235_s1 = inlined_call_operand.vmem [shape: f32[1,128], index: 1, kind: input, shape index: {}]   ;;  %s236_s2 = inlined_call_operand.vmem [shape: f32[4,128], index: 2, kind: input, shape index: {}]   ;;  %s237_s3 = inlined_call_operand.hbm [shape: f32[4,128], index: 3, kind: output, shape index: {}]  }
   0x1   :  { %9 = vsyncpa [#allocation4], 0  ;;  %s173_s12 = smov [#allocation2]   ;;  %s125_s16 = scalar_lea.hbm %s234_s0, 64 }
   0x2   :  { %s16_s13 = sshll.u32 %s173_s12, 4  ;;  %p126_p0 = scmp.ne.s32.totalorder %s234_s0, %s125_s16  ;;  %s17_s13 = int_to_ptr.vmem [resolvable:$true] %s16_s13 }
   0x3   :  { %p129_p1 = scmp.lt.u32.totalorder %s125_s16, %s234_s0 }
   0x5   :  { %p131_p2 = pnand %p129_p1, %p126_p0 }
   0x7   :  { %134 = shalt.err (!%p131_p2)
}
   0x8   :  { %s135_s21 = scalar_lea.vmem %s17_s13, 64  ;;  %p140_p4 = scmp.lt.s32.totalorder %s17_s13, %s17_s13 }
   0x9   :  { %p136_p3 = scmp.ne.s32.totalorder %s17_s13, %s135_s21  ;;  %p141_p5 = scmp.lt.s32.totalorder %s135_s21, %s135_s21 }
   0xb   :  { %p142_p6 = por %p141_p5, %p140_p4 }
   0xd   :  { %p143_p7 = pnand %p142_p6, %p136_p3 }
   0xf   :  { %146 = shalt.err (!%p143_p7)
}
  0x10   :  { %19 = dma.hbm_to_vmem [thread:$0]  %s234_s0, 64, %s17_s13, [#allocation3]  }
  0x11   :  { %169 = dma.done.wait [#allocation3], 64  }
  0x12   :  { %170 = vsyncadd [#allocation3], 4294967232  ;;  %v27_v0 = vld [vmem:[#allocation2] sm:$0xf]  ;;  %vm35_vm0 = vcmask 1043456   ;;  %s174_s5 = smov [#allocation5]  }
  0x13   :  { %v110_v1 = vld [vmem:[%s236_s2] ss:$0 sm:$0xff]  ;;  %v112_v2 = vld [vmem:[%s236_s2 + $0x2] ss:$0 sm:$0xff]  ;;  %v28_v3 = vmul.f32 %v27_v0, %v27_v0  ;;  %v111_v4 = vld [vmem:[%s236_s2 + $0x1] ss:$0 sm:$0xff] }
  0x14   :  { %v113_v5 = vld [vmem:[%s236_s2 + $0x3] ss:$0 sm:$0xff]  ;;  %v114_v37 = vld [vmem:[%s235_s1] ss:$0 sm:$0xff]  ;;  %s101_s6 = sshll.u32 %s174_s5, 4  ;;  %s102_s6 = int_to_ptr.vmem [resolvable:$true] %s101_s6 }
  0x15   :  { %v34_v6 = vmul.f32 %v110_v1, %v28_v3  ;;  %v62_v7 = vmul.f32 %v112_v2, %v28_v3  ;;  %v48_v8 = vmul.f32 %v111_v4, %v28_v3  ;;  %v76_v9 = vmul.f32 %v113_v5, %v28_v3  ;;  %s147_s7 = scalar_lea.vmem %s102_s6, 64  ;;  %p152_p9 = scmp.lt.s32.totalorder %s102_s6, %s102_s6 }
  0x16   :  { %p148_p8 = scmp.ne.s32.totalorder %s102_s6, %s147_s7  ;;  %p153_p10 = scmp.lt.s32.totalorder %s147_s7, %s147_s7 }
  0x17   :  { %v36_v10 = vsel %vm35_vm0, %v34_v6, 0.0  ;;  %v63_v11 = vsel %vm35_vm0, %v62_v7, 0.0  ;;  %v49_v12 = vsel %vm35_vm0, %v48_v8, 0.0  ;;  %v77_v13 = vsel %vm35_vm0, %v76_v9, 0.0 }
  0x18   :  { %37 = vadd.xlane.f32.xlu0 %v36_v10  ;;  %64 = vadd.xlane.f32.xlu1 %v63_v11  ;;  %p154_p11 = por %p153_p10, %p152_p9 }
  0x1a   :  { %p155_p12 = pnand %p154_p11, %p148_p8 }
  0x1c   :  { %50 = vadd.xlane.f32.xlu0 %v49_v12  ;;  %78 = vadd.xlane.f32.xlu1 %v77_v13 }
  0xa5   :  { %v38_v14 = vpop.xlane.xlu0 %37  ;;  %v65_v15 = vpop.xlane.xlu1 %64 }
  0xa6   :  { %v39_v16 = vmul.f32 0.03125, %v38_v14  ;;  %v66_v17 = vmul.f32 0.03125, %v65_v15 }
  0xa8   :  { %v40_v18 = vadd.f32 1e-05, %v39_v16  ;;  %v67_v19 = vadd.f32 1e-05, %v66_v17 }
  0xa9   :  { %v51_v20 = vpop.xlane.xlu0 %50  ;;  %v79_v21 = vpop.xlane.xlu1 %78 }
  0xaa   :  { %v52_v22 = vmul.f32 0.03125, %v51_v20  ;;  %v80_v23 = vmul.f32 0.03125, %v79_v21  ;;  %117 = vrsqrt.f32 %v40_v18 }
  0xab   :  { %119 = vrsqrt.f32 %v67_v19 }
  0xac   :  { %v53_v24 = vadd.f32 1e-05, %v52_v22  ;;  %v81_v25 = vadd.f32 1e-05, %v80_v23 }
  0xae   :  { %121 = vrsqrt.f32 %v53_v24 }
  0xaf   :  { %123 = vrsqrt.f32 %v81_v25 }
  0xb4   :  { %v118_v26 = vpop.eup %117 }
  0xb5   :  { %v120_v27 = vpop.eup %119  ;;  %v42_v30 = vmul.f32 %v118_v26, %v110_v1 }
  0xb6   :  { %v69_v33 = vmul.f32 %v120_v27, %v112_v2 }
  0xb8   :  { %v122_v28 = vpop.eup %121 }
  0xb9   :  { %v124_v29 = vpop.eup %123  ;;  %v55_v31 = vmul.f32 %v122_v28, %v111_v4 }
  0xba   :  { %v83_v34 = vmul.f32 %v124_v29, %v113_v5 }
  0xbb   :  { %v56_v32 = vadd.f32 %v55_v31, %v42_v30 }
  0xbd   :  { %v70_v35 = vadd.f32 %v69_v33, %v56_v32 }
  0xbf   :  { %v84_v36 = vadd.f32 %v83_v34, %v70_v35 }
  0xc1   :  { %v86_v38 = vmul.f32 %v84_v36, %v27_v0 }
  0xc3   :  { %v93_v39 = vmul.f32 %v114_v37, %v86_v38 }
  0xc5   :  { %94 = vst [vmem:[#allocation5] sm:$0xf] %v93_v39 }
  0xc6   :  { %158 = shalt.err (!%p155_p12)
}
  0xc7   :  { %s159_s10 = scalar_lea.hbm %s237_s3, 64 }
  0xc8   :  { %p160_p13 = scmp.ne.s32.totalorder %s237_s3, %s159_s10  ;;  %p163_p0 = scmp.lt.u32.totalorder %s159_s10, %s237_s3 }
  0xca   :  { %p165_p1 = pnand %p163_p0, %p160_p13 }
  0xcc   :  { %168 = shalt.err (!%p165_p1)
}
  0xcd   :  { %104 = dma.vmem_to_hbm [thread:$0]  %s102_s6, 64, %s237_s3, [#allocation4]  }
  0xce   :  { %171 = dma.done.wait [#allocation4], 64  }
  0xcf   :  { %172 = vsyncadd [#allocation4], 4294967232 }
  0xd0   :  { %108 = vsyncpa [#allocation3], 1 }
  0xd1   :  { %109 = vsyncpa [#allocation4], 1 }

</bundles_post_ra>
